<compile_context>
chip_gen: v7x
topology: tpu7x:2x2x1
jax: 0.10.0
libtpu: 0.0.40
codegen_flags: <defaults>
</compile_context>

<pallas_src>
import functools

import jax
import jax.numpy as jnp
import numpy as np
from jax.experimental import pallas as pl
from jax.experimental.pallas import tpu as pltpu

_EPS = 1e-5
_LANE = 128
_MAX_TN = 16384        # spatial tile cap (multiple of 128 lanes)
_MAX_MXU_M = 128       # flattened tb*C cap: one MXU tile width on all generations


def _round_up(v, m):
    return -(-v // m) * m


# --------------------------------------------------------------------------- #
# Kernel
# --------------------------------------------------------------------------- #
def _sod_kernel(x_ref, w_ref, b_ref, o_ref, g_acc, s_acc, *, n_total, precision):
    # x_ref: (1, M, TN) input dtype     w_ref: (M, M) f32 block-diag weight
    # b_ref: (M, 1) f32                 o_ref: (1, M, 1)
    # g_acc: (M, M) f32 Gram accumulator; s_acc: (M, 128) f32 partial row sums
    k = pl.program_id(1)

    @pl.when(k == 0)
    def _init():
        g_acc[...] = jnp.zeros_like(g_acc)
        s_acc[...] = jnp.zeros_like(s_acc)

    xb = x_ref[0]                                        # (M, TN)

    # Raw (un-normalized) Gram on the MXU: one flattened matmul per grid step,
    # f32 accumulation, explicit precision.
    g_acc[...] += jax.lax.dot_general(
        xb, xb, (((1,), (1,)), ((), ())),
        preferred_element_type=jnp.float32, precision=precision)

    # Lane-dense partial row sums: static 128-lane slices, pure VALU adds;
    # the single cross-lane reduce is deferred to finalize.
    tn = xb.shape[-1]
    part = xb[:, 0:_LANE].astype(jnp.float32)
    for j in range(1, tn // _LANE):
        part = part + xb[:, j * _LANE:(j + 1) * _LANE].astype(jnp.float32)
    s_acc[...] += part

    @pl.when(k == pl.num_programs(1) - 1)
    def _finalize():
        m = g_acc.shape[0]
        n_f = float(n_total)
        inv_n = 1.0 / n_f

        g = g_acc[...]                                               # (M, M)
        mean = jnp.sum(s_acc[...], axis=-1, keepdims=True) * inv_n   # (M, 1)
        mean_t = jnp.swapaxes(mean, 0, 1)                            # (1, M)
        # Deferred centering: cov = G - N m m^T.  Off-block-diagonal entries mix
        # different batches but are zeroed by the block-diagonal weight below.
        # TODO(synk): for data with |mean| >> sigma this one-pass centering can
        # cancel badly; a two-pass (center-then-Gram) variant would be safer.
        cov = g - (mean * mean_t) * n_f                              # (M, M)

        # Biased variance straight from the Gram diagonal; clamp against
        # cancellation-induced tiny negatives before rsqrt.
        row = jax.lax.broadcasted_iota(jnp.int32, (m, m), 0)
        col = jax.lax.broadcasted_iota(jnp.int32, (m, m), 1)
        eye = (row == col).astype(jnp.float32)
        var = jnp.maximum(jnp.sum(cov * eye, axis=-1, keepdims=True) * inv_n, 0.0)
        inv_s = jax.lax.rsqrt(var + _EPS)                            # (M, 1)

        # corr = x1 @ x1^T == (1/sigma_i)(1/sigma_j) * cov_ij
        corr = cov * (inv_s * jnp.swapaxes(inv_s, 0, 1))             # (M, M)

        # Depthwise "rowwise" conv.  corr is symmetric per batch block, so
        # out[p] = sum_q Wbd[p,q] * corr[p,q] + bias[p] with Wbd = kron(I, W).
        out = jnp.sum(w_ref[...] * corr, axis=-1, keepdims=True) + b_ref[...]
        o_ref[0] = out.astype(o_ref.dtype)


# --------------------------------------------------------------------------- #
# Tiling / VMEM planning
# --------------------------------------------------------------------------- #
def _vmem_limits():
    """(vmem_limit_bytes, tile-fit budget) - generation aware."""
    try:
        phys = int(pltpu.get_tpu_info().vmem_capacity_bytes)
    except Exception:
        phys = 64 << 20                       # conservative (v7x physical) fallback
    limit = min((phys * 3) // 4, 96 << 20)    # v5e/v6e -> 96 MiB, v7x -> 48 MiB
    return limit, limit - (4 << 20)           # headroom for compiler scratch


def _block_bytes(tb, tn, channels, x_itemsize, out_itemsize):
    """Steady-state VMEM: double-buffered x/w/bias/out blocks (incl. sublane and
    128-lane padding of narrow buffers) plus the persistent f32 scratch."""
    m = tb * channels
    sub_x = 8 * max(1, 4 // x_itemsize)
    sub_o = 8 * max(1, 4 // out_itemsize)
    m_lane = _round_up(m, _LANE)
    need = 2 * _round_up(m, sub_x) * tn * x_itemsize           # x (double buffer)
    need += 2 * _round_up(m, 8) * m_lane * 4                   # block-diag weight
    need += 2 * _round_up(m, 8) * _LANE * 4                    # bias (lane-padded)
    need += 2 * _round_up(m, sub_o) * _LANE * out_itemsize     # output block
    need += _round_up(m, 8) * m_lane * 4                       # g_acc scratch
    need += _round_up(m, 8) * _LANE * 4                        # s_acc scratch
    return need


def _pick_tiles(batch, channels, n, x_itemsize, out_itemsize, budget):
    n128 = _round_up(n, _LANE)
    tn_cands = sorted({c for c in (128, 256, 512, 1024, 2048, 4096, 8192, 16384)
                       if c <= n128} | {min(n128, _MAX_TN)}, reverse=True)
    # tb | B, flattened tb*C fits one MXU tile, and keep >= 2 batch groups on
    # the "parallel" axis whenever possible so v7x's two TCs both get work.
    tb_cap = max(1, batch // 2)
    tb_cands = [d for d in range(batch, 0, -1)
                if batch % d == 0 and d <= tb_cap
                and (d == 1 or d * channels <= _MAX_MXU_M)]

    best_cfg, best_key = None, None
    for tb in tb_cands:
        for tn in tn_cands:                 # descending: first fit = largest tn
            if _block_bytes(tb, tn, channels, x_itemsize, out_itemsize) <= budget:
                steps = (batch // tb) * (-(-n // tn))
                key = (steps, -tn, -tb)     # fewest grid steps, then biggest DMAs
                if best_key is None or key < best_key:
                    best_cfg, best_key = (tb, tn), key
                break
    if best_cfg is None:                    # pathological shapes: minimum tiles
        return 1, _LANE
    return best_cfg


# --------------------------------------------------------------------------- #
# Wrapper
# --------------------------------------------------------------------------- #
def second_order_downsample(x, conv_weight, conv_bias, *, precision=None):
    """x: (B, C, H, W), conv_weight: (C, 1, 1, C), conv_bias: (C,) -> (B, C, 1, 1)."""
    B, C, H, W = x.shape
    N = H * W
    out_dtype = x.dtype

    # Explicit MXU precision (review): faithful f32 Gram for f32 inputs; callers
    # may pass precision=DEFAULT (or cast x to bf16) to trade accuracy for speed.
    if precision is None:
        precision = (jax.lax.Precision.HIGHEST if x.dtype == jnp.float32
                     else jax.lax.Precision.DEFAULT)

    vmem_limit, budget = _vmem_limits()
    tb, tn = _pick_tiles(B, C, N, x.dtype.itemsize,
                         jnp.dtype(out_dtype).itemsize, budget)
    groups = B // tb
    M = tb * C
    n_pad = _round_up(N, tn)

    x2 = x.reshape(B * C, N)
    if n_pad != N:                 # zero-pad: exact for both Gram and row sums
        x2 = jnp.pad(x2, ((0, 0), (0, n_pad - N)))
    x3 = x2.reshape(groups, M, n_pad)          # free, contiguous regrouping

    w2 = conv_weight.reshape(C, C).astype(jnp.float32)
    w_bd = jnp.kron(jnp.eye(tb, dtype=jnp.float32), w2)               # (M, M)
    b_bd = jnp.tile(conv_bias.astype(jnp.float32), tb).reshape(M, 1)  # (M, 1)

    grid = (groups, n_pad // tn)

    out = pl.pallas_call(
        functools.partial(_sod_kernel, n_total=N, precision=precision),
        out_shape=jax.ShapeDtypeStruct((groups, M, 1), out_dtype),
        grid=grid,
        in_specs=[
            pl.BlockSpec((1, M, tn), lambda b, k: (b, 0, k)),
            pl.BlockSpec((M, M), lambda b, k: (0, 0)),
            pl.BlockSpec((M, 1), lambda b, k: (0, 0)),
        ],
        out_specs=pl.BlockSpec((1, M, 1), lambda b, k: (b, 0, 0)),
        scratch_shapes=[
            pltpu.VMEM((M, M), jnp.float32),       # Gram accumulator
            pltpu.VMEM((M, _LANE), jnp.float32),   # lane-dense row-sum partials
        ],
        compiler_params=pltpu.CompilerParams(
            dimension_semantics=("parallel", "arbitrary"),
            vmem_limit_bytes=vmem_limit),
    )(x3, w_bd, b_bd)

    return out.reshape(B, C, 1, 1)


# --------------------------------------------------------------------------- #
# Reference + self-test
# --------------------------------------------------------------------------- #
def _reference_f64(x, conv_weight, conv_bias):
    x = np.asarray(x, dtype=np.float64)
    B, C, H, W = x.shape
    w = np.asarray(conv_weight, dtype=np.float64).reshape(C, C)
    b = np.asarray(conv_bias, dtype=np.float64)
    x1 = x.reshape(B, C, -1)
    mean = x1.mean(-1, keepdims=True)
    var = ((x1 - mean) ** 2).mean(-1, keepdims=True)      # biased variance
    x1 = (x1 - mean) / np.sqrt(var + _EPS)
    corr = np.einsum("bcn,bdn->bcd", x1, x1)
    out = np.einsum("cw,bwc->bc", w, corr) + b
    return out.reshape(B, C, 1, 1)


if __name__ == "__main__":
    B, C, H, W = 2, 4, 16, 16

    key = jax.random.PRNGKey(0)
    kx, kw, kb = jax.random.split(key, 3)

    # Inputs rounded to bf16-representable f32 so the comparison stays tight
    # regardless of how the backend realizes the requested matmul precision;
    # the kernel itself requests Precision.HIGHEST for genuine f32 fidelity.
    x = jax.random.normal(kx, (B, C, H, W), dtype=jnp.float32)
    x = x.astype(jnp.bfloat16).astype(jnp.float32)

    # Conv2d-style init: uniform(-k, k), k = 1/sqrt(fan_in), fan_in = 1*1*C.
    k = 1.0 / np.sqrt(C)
    conv_weight = jax.random.uniform(kw, (C, 1, 1, C), jnp.float32, -k, k)
    conv_bias = jax.random.uniform(kb, (C,), jnp.float32, -k, k)

    out = second_order_downsample(x, conv_weight, conv_bias)
    out = jax.block_until_ready(out)

    ref = _reference_f64(x, conv_weight, conv_bias)
    np.testing.assert_allclose(np.asarray(out, dtype=np.float64), ref,
                               rtol=5e-4, atol=5e-3)
    assert out.shape == (B, C, 1, 1)

    print("KERNEL_OK")
</pallas_src>

<mosaic_0001>
module attributes {stable_mosaic.version = 11 : i64} {
  func.func @_sod_kernel(%arg0: i32, %arg1: i32, %arg2: memref<1x4x256xf32, #tpu.memory_space<vmem>>, %arg3: memref<4x4xf32, #tpu.memory_space<vmem>>, %arg4: memref<4x1xf32, #tpu.memory_space<vmem>>, %arg5: memref<1x4x1xf32, #tpu.memory_space<vmem>>, %arg6: memref<4x4xf32, #tpu.memory_space<vmem>>, %arg7: memref<4x128xf32, #tpu.memory_space<vmem>>) attributes {dimension_semantics = [#tpu.dimension_semantics<parallel>, #tpu.dimension_semantics<arbitrary>], iteration_bounds = array<i64: 2, 1>, scalar_prefetch = 0 : i64, scratch_operands = 2 : i64, tpu.core_type = #tpu.core_type<tc>, window_params = [{transform_indices = @transform_0, window_bounds = array<i64: 1, 4, 256>}, {pipeline_mode = #tpu.pipeline_mode<synchronous>, transform_indices = @transform_1, window_bounds = array<i64: 4, 4>}, {pipeline_mode = #tpu.pipeline_mode<synchronous>, transform_indices = @transform_2, window_bounds = array<i64: 4, 1>}, {transform_indices = @transform_3, window_bounds = array<i64: 1, 4, 1>}]} {
    %c0_i32 = arith.constant 0 : i32
    %0 = arith.cmpi eq, %arg1, %c0_i32 : i32
    %1 = arith.extui %0 : i1 to i32
    %c0_i32_0 = arith.constant 0 : i32
    %2 = arith.cmpi ne, %1, %c0_i32_0 : i32
    scf.if %2 {
      %cst_13 = arith.constant 0.000000e+00 : f32
      %18 = vector.broadcast %cst_13 : f32 to vector<4x4xf32>
      %c0_14 = arith.constant 0 : index
      %c0_15 = arith.constant 0 : index
      %19 = vector.load %arg6[%c0_14, %c0_15] : memref<4x4xf32, #tpu.memory_space<vmem>>, vector<4x4xf32>
      tpu.vector_store %arg6[%c0_14, %c0_15], %18 {strides = array<i32>} : memref<4x4xf32, #tpu.memory_space<vmem>>, vector<4x4xf32>,
      %cst_16 = arith.constant 0.000000e+00 : f32
      %20 = vector.broadcast %cst_16 : f32 to vector<4x128xf32>
      %c0_17 = arith.constant 0 : index
      %c0_18 = arith.constant 0 : index
      %21 = vector.load %arg7[%c0_17, %c0_18] : memref<4x128xf32, #tpu.memory_space<vmem>>, vector<4x128xf32>
      tpu.vector_store %arg7[%c0_17, %c0_18], %20 {strides = array<i32>} : memref<4x128xf32, #tpu.memory_space<vmem>>, vector<4x128xf32>,
    } else {
    }
    %c0 = arith.constant 0 : index
    %c0_1 = arith.constant 0 : index
    %c0_2 = arith.constant 0 : index
    %3 = vector.load %arg2[%c0, %c0_1, %c0_2] : memref<1x4x256xf32, #tpu.memory_space<vmem>>, vector<1x4x256xf32>
    %4 = vector.shape_cast %3 : vector<1x4x256xf32> to vector<4x256xf32>
    %c0_3 = arith.constant 0 : index
    %c0_4 = arith.constant 0 : index
    %5 = vector.load %arg6[%c0_3, %c0_4] : memref<4x4xf32, #tpu.memory_space<vmem>>, vector<4x4xf32>
    %cst = arith.constant dense<0.000000e+00> : vector<4x4xf32>
    %6 = tpu.matmul %4, %4, %cst {dimension_numbers = #tpu.dot_dimension_numbers<[1], [1], [0], [0], [0, 0, 1, 0], [], []>, precision = #tpu.contract_precision<fp32>} : vector<4x256xf32>, vector<4x256xf32>, vector<4x4xf32> -> vector<4x4xf32>
    %7 = arith.addf %5, %6 : vector<4x4xf32>
    %c0_5 = arith.constant 0 : index
    %c0_6 = arith.constant 0 : index
    %8 = vector.load %arg6[%c0_5, %c0_6] : memref<4x4xf32, #tpu.memory_space<vmem>>, vector<4x4xf32>
    tpu.vector_store %arg6[%c0_5, %c0_6], %7 {strides = array<i32>} : memref<4x4xf32, #tpu.memory_space<vmem>>, vector<4x4xf32>,
    %9 = vector.extract_strided_slice %4 {offsets = [0, 0], sizes = [4, 128], strides = [1, 1]} : vector<4x256xf32> to vector<4x128xf32>
    %10 = vector.extract_strided_slice %4 {offsets = [0, 128], sizes = [4, 128], strides = [1, 1]} : vector<4x256xf32> to vector<4x128xf32>
    %11 = arith.addf %9, %10 : vector<4x128xf32>
    %c0_7 = arith.constant 0 : index
    %c0_8 = arith.constant 0 : index
    %12 = vector.load %arg7[%c0_7, %c0_8] : memref<4x128xf32, #tpu.memory_space<vmem>>, vector<4x128xf32>
    %13 = arith.addf %12, %11 : vector<4x128xf32>
    %c0_9 = arith.constant 0 : index
    %c0_10 = arith.constant 0 : index
    %14 = vector.load %arg7[%c0_9, %c0_10] : memref<4x128xf32, #tpu.memory_space<vmem>>, vector<4x128xf32>
    tpu.vector_store %arg7[%c0_9, %c0_10], %13 {strides = array<i32>} : memref<4x128xf32, #tpu.memory_space<vmem>>, vector<4x128xf32>,
    %c0_i32_11 = arith.constant 0 : i32
    %15 = arith.cmpi eq, %arg1, %c0_i32_11 : i32
    %16 = arith.extui %15 : i1 to i32
    %c0_i32_12 = arith.constant 0 : i32
    %17 = arith.cmpi ne, %16, %c0_i32_12 : i32
    scf.if %17 {
      %c0_13 = arith.constant 0 : index
      %c0_14 = arith.constant 0 : index
      %18 = vector.load %arg6[%c0_13, %c0_14] : memref<4x4xf32, #tpu.memory_space<vmem>>, vector<4x4xf32>
      %c0_15 = arith.constant 0 : index
      %c0_16 = arith.constant 0 : index
      %19 = vector.load %arg7[%c0_15, %c0_16] : memref<4x128xf32, #tpu.memory_space<vmem>>, vector<4x128xf32>
      %cst_17 = arith.constant dense<0.000000e+00> : vector<4xf32>
      %20 = vector.multi_reduction <add>, %19, %cst_17 [1] : vector<4x128xf32> to vector<4xf32>
      %21 = vector.shape_cast %20 : vector<4xf32> to vector<4x1xf32>
      %cst_18 = arith.constant 3.906250e-03 : f32
      %22 = vector.broadcast %cst_18 : f32 to vector<4x1xf32>
      %23 = arith.mulf %21, %22 : vector<4x1xf32>
      %24 = tpu.transpose %23, [1, 0] : vector<4x1xf32> -> vector<1x4xf32>
      %25 = vector.broadcast %23 : vector<4x1xf32> to vector<4x4xf32>
      %26 = vector.broadcast %24 : vector<1x4xf32> to vector<4x4xf32>
      %27 = arith.mulf %25, %26 : vector<4x4xf32>
      %cst_19 = arith.constant 2.560000e+02 : f32
      %28 = vector.broadcast %cst_19 : f32 to vector<4x4xf32>
      %29 = arith.mulf %27, %28 : vector<4x4xf32>
      %30 = arith.subf %18, %29 : vector<4x4xf32>
      %31 = tpu.iota {dimensions = array<i32: 0>} : vector<4x4xi32>
      %32 = tpu.iota {dimensions = array<i32: 1>} : vector<4x4xi32>
      %33 = arith.cmpi eq, %31, %32 : vector<4x4xi32>
      %34 = arith.extui %33 : vector<4x4xi1> to vector<4x4xi32>
      %35 = arith.sitofp %34 : vector<4x4xi32> to vector<4x4xf32>
      %36 = arith.mulf %30, %35 : vector<4x4xf32>
      %cst_20 = arith.constant dense<0.000000e+00> : vector<4xf32>
      %37 = vector.multi_reduction <add>, %36, %cst_20 [1] : vector<4x4xf32> to vector<4xf32>
      %38 = vector.shape_cast %37 : vector<4xf32> to vector<4x1xf32>
      %cst_21 = arith.constant 3.906250e-03 : f32
      %39 = vector.broadcast %cst_21 : f32 to vector<4x1xf32>
      %40 = arith.mulf %38, %39 : vector<4x1xf32>
      %cst_22 = arith.constant 0.000000e+00 : f32
      %41 = vector.broadcast %cst_22 : f32 to vector<4x1xf32>
      %42 = arith.maximumf %40, %41 : vector<4x1xf32>
      %cst_23 = arith.constant 9.99999974E-6 : f32
      %43 = vector.broadcast %cst_23 : f32 to vector<4x1xf32>
      %44 = arith.addf %42, %43 : vector<4x1xf32>
      %45 = math.rsqrt %44 : vector<4x1xf32>
      %46 = tpu.transpose %45, [1, 0] : vector<4x1xf32> -> vector<1x4xf32>
      %47 = vector.broadcast %45 : vector<4x1xf32> to vector<4x4xf32>
      %48 = vector.broadcast %46 : vector<1x4xf32> to vector<4x4xf32>
      %49 = arith.mulf %47, %48 : vector<4x4xf32>
      %50 = arith.mulf %30, %49 : vector<4x4xf32>
      %c0_24 = arith.constant 0 : index
      %c0_25 = arith.constant 0 : index
      %51 = vector.load %arg3[%c0_24, %c0_25] : memref<4x4xf32, #tpu.memory_space<vmem>>, vector<4x4xf32>
      %52 = arith.mulf %51, %50 : vector<4x4xf32>
      %cst_26 = arith.constant dense<0.000000e+00> : vector<4xf32>
      %53 = vector.multi_reduction <add>, %52, %cst_26 [1] : vector<4x4xf32> to vector<4xf32>
      %54 = vector.shape_cast %53 : vector<4xf32> to vector<4x1xf32>
      %c0_27 = arith.constant 0 : index
      %c0_28 = arith.constant 0 : index
      %55 = vector.load %arg4[%c0_27, %c0_28] : memref<4x1xf32, #tpu.memory_space<vmem>>, vector<4x1xf32>
      %56 = arith.addf %54, %55 : vector<4x1xf32>
      %c0_29 = arith.constant 0 : index
      %c0_30 = arith.constant 0 : index
      %c0_31 = arith.constant 0 : index
      %57 = vector.load %arg5[%c0_29, %c0_30, %c0_31] : memref<1x4x1xf32, #tpu.memory_space<vmem>>, vector<1x4x1xf32>
      %58 = vector.shape_cast %57 : vector<1x4x1xf32> to vector<4x1xf32>
      %59 = vector.shape_cast %56 : vector<4x1xf32> to vector<1x4x1xf32>
      tpu.vector_store %arg5[%c0_29, %c0_30, %c0_31], %59 {strides = array<i32>} : memref<1x4x1xf32, #tpu.memory_space<vmem>>, vector<1x4x1xf32>,
    } else {
    }
    return
  }
  func.func @transform_0(%arg0: i32, %arg1: i32) -> (i32, i32, i32) {
    %c0_i32 = arith.constant 0 : i32
    %c0_i32_0 = arith.constant 0 : i32
    return %arg0, %c0_i32, %arg1 : i32, i32, i32
  }
  func.func @transform_1(%arg0: i32, %arg1: i32) -> (i32, i32) {
    %c0_i32 = arith.constant 0 : i32
    %c0_i32_0 = arith.constant 0 : i32
    %c0_i32_1 = arith.constant 0 : i32
    return %c0_i32, %c0_i32_0 : i32, i32
  }
  func.func @transform_2(%arg0: i32, %arg1: i32) -> (i32, i32) {
    %c0_i32 = arith.constant 0 : i32
    %c0_i32_0 = arith.constant 0 : i32
    %c0_i32_1 = arith.constant 0 : i32
    return %c0_i32, %c0_i32_0 : i32, i32
  }
  func.func @transform_3(%arg0: i32, %arg1: i32) -> (i32, i32, i32) {
    %c0_i32 = arith.constant 0 : i32
    %c0_i32_0 = arith.constant 0 : i32
    %c0_i32_1 = arith.constant 0 : i32
    return %arg0, %c0_i32, %c0_i32_0 : i32, i32, i32
  }
}

</mosaic_0001>

<bundles_post_ra>
// kernel: tpu_custom_call.1
= control target key start
LH: loop header
LB: loop body
LE: loop exit
PB: predicated region body
PF: predicated region fallthrough
CT: control target
= control target key end

     0   :  { %8 = vsyncpa [#allocation5], 0  ;;  %s1199_s0 = inlined_call_operand.hbm [shape: f32[2,4,256], index: 0, kind: input, shape index: {}]   ;;  %s1200_s1 = inlined_call_operand.vmem [shape: f32[4,4], index: 1, kind: input, shape index: {}]   ;;  %s1201_s2 = inlined_call_operand.vmem [shape: f32[4,1], index: 2, kind: input, shape index: {}]   ;;  %s1202_s3 = inlined_call_operand.vmem [shape: f32[2,4,1], index: 3, kind: output, shape index: {}]  }
   0x1   :  { %10 = vsyncpa [#allocation5 + $0x1], 0  ;;  %s1061_s12 = smov 0   ;;  %s1063_s13 = smov 0  }
   0x2   :  { %s1065_s14 = smov 0   ;;  %s1067_s15 = smov 0  }
   0x3   :  { %s1069_s16 = smov 0   ;;  %s1071_s17 = smov 0  }
   0x4 LB: > { %s884_s18 = sadd.s32 4294967295, %s1037_s17   ;;  %s28_s19 = sadd.s32 1, %s1033_s16  ;;  %s1037_s17 = sphi %s1071_s17, %s16_s17   ;;  %s1033_s16 = sphi %s1069_s16, %s1212_s16   ;;  %s1029_s15 = sphi %s1067_s15, %s1211_s15   ;;  %s1025_s14 = sphi %s1065_s14, %s1210_s14   ;;  %s1021_s13 = sphi %s1063_s13, %s1209_s13   ;;  %s1017_s12 = sphi %s1061_s12, %s1208_s12  }
   0x5   : > { %p30_p0 = scmp.ge.s32.totalorder %s28_s19, 2  ;;  %s37_s20 = sadd.s32 1, %s1025_s14 }
   0x6   : > { %p44_p1 = scmp.ne.s32.totalorder %s1025_s14, %s1021_s13  ;;  %p45_p2 = scmp.eq.s32.totalorder %s1037_s17, 0 }
   0x7   : > { %s1214_s19 = smov (%p30_p0, %s28_s19), 0  ;;  %p50_p4 = scmp.ne.s32.totalorder %s1021_s13, %s1017_s12 }
   0x8   : > { %p1097_p3 = por %p45_p2, %p44_p1  ;;  %s32_s22 = ssub.s32 %s1033_s16, %s1214_s19 }
   0x9   : > { %p51_p5 = scmp.eq.s32.totalorder %s884_s18, 0  ;;  %p35_p6 = scmp.eq.s32.totalorder %s32_s22, 0 }
   0xa   : > { %p904_p8 = scmp.lt.s32.totalorder %s1037_s17, 2  ;;  %s148_s25 = sand.u32 1, %s1025_s14  }
   0xb   : > { %p1104_p7 = por %p51_p5, %p50_p4  ;;  %s897_s26 = sshll.u32 %s1033_s16, 7 }
   0xc   : > { %s1110_s24 = scalar_select %p35_p6, %s1025_s14, %s37_s20  }
   0xd   : > { %s888_s27 = sshll.u32 %s148_s25, 3  ;;  %s1117_s30 = scalar_lea.hbm %s1199_s0, %s897_s26 }
   0xe   : > { %s152_s4 = scalar_lea.vmem [#allocation4], %s888_s27  ;;  %p1121_p9 = pnand %p904_p8, %p1097_p3 }
   0xf   : > { %s162_s5 = sshll.u32 %s152_s4, 4  ;;  %s149_s7 = scalar_lea.sflag [#allocation5], %s148_s25  ;;  %s1125_s5 = int_to_ptr.vmem [resolvable:$true] %s162_s5 }
  0x10   : > { %s957_s8 = scalar_lea.hbm %s1117_s30, 128  ;;  %p959_p13 = pneg %p1121_p9 }
  0x11   : > { %p958_p12 = scmp.ne.s32.totalorder %s1117_s30, %s957_s8  ;;  %s962_s11 = scalar_lea.hbm %s1199_s0, 256 }
  0x12   : > { %p963_p2 = scmp.lt.u32.totalorder %s1117_s30, %s1199_s0  ;;  %p964_p3 = scmp.lt.u32.totalorder %s962_s11, %s957_s8 }
  0x13   : > { %p960_p0 = pnand %p959_p13, %p958_p12  ;;  %p966_p5 = scmp.lt.u32.totalorder %s957_s8, %s1117_s30 }
  0x14   : > { %p965_p4 = por %p964_p3, %p963_p2 }
  0x15   : > { %p961_p1 = pneg %p960_p0 }
  0x16   : > { %p967_p6 = por %p966_p5, %p965_p4 }
  0x18   : > { %p968_p8 = pnand %p967_p6, %p961_p1 }
  0x1a   : > { %971 = shalt.err (!%p968_p8)
}
  0x1b   : > { %s972_s20 = scalar_lea.vmem %s1125_s5, 128  ;;  %s1039_s21 = smov [#allocation4]  }
  0x1c   : > { %p973_p12 = scmp.ne.s32.totalorder %s1125_s5, %s972_s20  ;;  %s977_s22 = sshll.u32 %s1039_s21, 4  ;;  %s978_s22 = int_to_ptr.vmem [resolvable:$false] %s977_s22 }
  0x1d   : > { %s979_s25 = scalar_lea.vmem %s978_s22, 256  ;;  %p980_p11 = scmp.lt.s32.totalorder %s1125_s5, %s978_s22 }
  0x1e   : > { %p975_p0 = pnand %p973_p12, %p959_p13  ;;  %p981_p2 = scmp.lt.s32.totalorder %s979_s25, %s972_s20 }
  0x20   : > { %p976_p10 = pneg %p975_p0  ;;  %p982_p3 = por %p981_p2, %p980_p11 }
  0x22   : > { %p983_p4 = pnand %p982_p3, %p976_p10 }
  0x24   : > { %986 = shalt.err (!%p983_p4)
}
  0x25   : > { %903 = dma.hbm_to_vmem [thread:$0]  (!%p1121_p9), %s1117_s30, 128, %s1125_s5, %s149_s7  }
  0x26   : > { %p1206_p1 = scmp.lt.s32.totalorder %s1037_s17, 3  ;;  %p1207_p5 = scmp.ge.s32.totalorder %s1037_s17, 1 }
  0x28   : > { %p168_p13 = pnand %p1207_p5, %p1206_p1 }
  0x29   : > { %s173_s26 = sand.u32 (!%p168_p13), 1, %s1021_s13  }
  0x2a   : > { %171 = sbr.rel (%p168_p13) target bundleno = 796 (0x31c), region = 32  ;;  %s892_s27 = sshll.u32 (!%p168_p13), %s173_s26, 3 }
  0x2b   : > { %s174_s28 = scalar_lea.sflag (!%p168_p13), [#allocation5], %s173_s26  ;;  %s177_s29 = scalar_lea.vmem (!%p168_p13), [#allocation4], %s892_s27 }
  0x31   : > { %1012 = dma.done.wait (%p1104_p7), %s174_s28, 128  }
  0x32   : > { %1014 = vsyncadd (%p1104_p7), %s174_s28, 4294967168  ;;  %v1040_v0 = vmov 0.0   ;;  %v211_v1 = vld [vmem:[%s177_s29] sm:$0xff]  ;;  %vm702_vm0 = vcmask 1043456   ;;  %vm208_vm1 = vcmask 27648   ;;  %v739_v40 = vlaneseq  ;;  %p200_p7 = scmp.lt.s32.totalorder %s1029_s15, 1 }
  0x33   : > { %210 = vst [vmem:[#allocation3] sm:$0xf] %v1040_v0  ;;  %v691_v2 = vrot.slane %v211_v1, 4  ;;  %v214_v3 = vcombine.high %v211_v1, %v211_v1  ;;  %v218_v4 = vand.u32 4294901760, %v211_v1  ;;  %209 = vst.msk [vmem:[#allocation2] sm:$0xf] %vm208_vm1, %v1040_v0 }
  0x34   : > { %v740_v41 = vshrl.u32 %v739_v40, 7  ;;  %v749_v43 = vand.u32 127, %v739_v40  ;;  %v799_v61 = vld [vmem:[%s1200_s1] sm:$0xf]  ;;  %s1216_s15 = smov (!%p200_p7, %s1029_s15), 1  ;;  %vm806_vm3 = vcmask 3072  }
  0x35   : > { %v693_v6 = vadd.f32 %v691_v2, %v211_v1  ;;  %v216_v7 = vand.u32 4294901760, %v214_v3  ;;  %v289_v8 = vsub.f32 %v211_v1, %v218_v4  ;;  %s893_s4 = sshll.u32 %s1216_s15, 2  ;;  %v804_v1 = vld [vmem:[%s1201_s2] sm:$0xf] }
  0x36   : > { %v741_v42 = vsub.s32 0, %v740_v41  ;;  %vm750_vm2 = vcmp.eq.s32.totalorder %v740_v41, %v749_v43  ;;  %s203_s9 = scalar_lea.vmem %s1202_s3, %s893_s4 }
  0x37   : > { %217 = vmatprep.subr.mxu0 %v216_v7  ;;  %v283_v10 = vsub.f32 %v214_v3, %v216_v7  ;;  %v290_v11 = vand.u32 4294901760, %v289_v8  ;;  %373 = vmatprep.mubr.f32.mxu1 %v216_v7  ;;  %v894_v49 = vsel %vm750_vm2, 1.0, %v1040_v0 }
  0x38   : > { %219 = vmatpush1.xpose.msra.mxu0 %v218_v4 }
  0x39   : > { %v284_v12 = vand.u32 4294901760, %v283_v10  ;;  %v291_v13 = vsub.f32 %v289_v8, %v290_v11  ;;  %382 = vmatprep.subr.mxu0 %v283_v10 }
  0x3a   : > { %v694_v5 = vld [vmem:[#allocation3] sm:$0xf]  ;;  %v212_v35 = vld [vmem:[#allocation2] sm:$0xf] }
  0x3b   : > { %v695_v9 = vadd.f32 %v694_v5, %v693_v6  ;;  %v285_v14 = vsub.f32 %v283_v10, %v284_v12  ;;  %v292_v15 = vand.u32 4294901760, %v291_v13 }
  0x3d   : > { %696 = vst [vmem:[#allocation3] sm:$0xf] %v695_v9  ;;  %v286_v16 = vand.u32 4294901760, %v285_v14 }
  0x3f   : > { %303 = vmatprep.subr.mxu1 %v286_v16  ;;  %287 = vmatprep.mubr.f32.mxu0 %v286_v16 }
  0x40   : > { %309 = vmatpush1.xpose.msra.mxu1 %v292_v15  ;;  %293 = vmatmul.mubr.f32.vlgmr.msra.gmra.mrb[0].mxu0 %v292_v15 }
  0x41   : > { %385 = vmatpush1.xpose.msra.mxu0 %v289_v8  ;;  %459 = vmatprep.subr.mxu1 %v216_v7 }
  0x42   : > { %450 = vmatprep.mubr.f32.mxu0 %v283_v10  ;;  %539 = vmatprep.subr.mxu0 %v284_v12 }
  0x43   : > { %375 = vmatmul.mubr.f32.vlgmr.msra.gmra.mrb[0].mxu1 %v218_v4 }
  0x44   : > { %v701_v17 = vld [vmem:[#allocation3] sm:$0xf]  ;;  %461 = vmatpush1.xpose.msra.mxu1 %v218_v4  ;;  %453 = vmatmul.mubr.f32.vlgmr.msra.gmra.mrb[2].mxu0 %v289_v8 }
  0x45   : > { %v703_v18 = vsel %vm702_vm0, %v701_v17, 0.0  ;;  %527 = vmatprep.mubr.f32.mxu1 %v284_v12  ;;  %543 = vmatpush1.xpose.msra.mxu0 %v290_v11 }
  0x46   : > { %704 = vadd.xlane.f32.xlu0 %v703_v18  ;;  %615 = vmatprep.subr.mxu1 %v216_v7 }
  0x47   : > { %607 = vmatprep.mubr.f32.mxu0 %v216_v7  ;;  %531 = vmatmul.mubr.f32.vlgmr.msra.gmra.mrb[2].mxu1 %v290_v11 }
  0x48   : > { %617 = vmatpush1.xpose.msra.mxu1 %v218_v4  ;;  %609 = vmatmul.mubr.f32.vlgmr.msra.gmra.mrb[4].mxu0 %v218_v4 }
  0x49   : > { %681 = vmatprep.mubr.f32.mxu1 %v216_v7 }
  0x4b   : > { %683 = vmatmul.mubr.f32.vlgmr.msra.gmra.mrb[4].mxu1 %v218_v4 }
  0xd3   : > { %v705_v19 = vpop.xlane.xlu0 %704 }
  0xd4   : > { %v706_v20 = vmul.f32 0.00390625, %v705_v19 }
  0xd6   : > { %707 = vxpose.xlu0.b32.start.end [1/1] (short) (narrow) %v706_v20, 8 }
 0x113   : > { %v294_v21 = vpop.f32.mrb[0].mxu0 }
 0x114   : > { %v296_v22 = vpop.f32.mrb[1].mxu0 }
 0x116   : > { %v376_v23 = vpop.f32.mrb[0].mxu1 }
 0x117   : > { %v377_v24 = vadd.f32 %v376_v23, %v294_v21  ;;  %v378_v25 = vpop.f32.mrb[1].mxu1  ;;  %v454_v26 = vpop.f32.mrb[2].mxu0 }
 0x118   : > { %v456_v27 = vpop.f32.mrb[3].mxu0 }
 0x119   : > { %v455_v28 = vadd.f32 %v454_v26, %v377_v24 }
 0x11a   : > { %v532_v29 = vpop.f32.mrb[2].mxu1 }
 0x11b   : > { %v533_v30 = vadd.f32 %v532_v29, %v455_v28  ;;  %v534_v31 = vpop.f32.mrb[3].mxu1  ;;  %v610_v32 = vpop.f32.mrb[4].mxu0 }
 0x11c   : > { %v612_v33 = vpop.f32.mrb[5].mxu0 }
 0x11d   : > { %v611_v34 = vadd.f32 %v610_v32, %v533_v30 }
 0x11e   : > { %v684_v36 = vpop.f32.mrb[4].mxu1 }
 0x11f   : > { %v685_v37 = vadd.f32 %v684_v36, %v611_v34  ;;  %v686_v38 = vpop.f32.mrb[5].mxu1 }
 0x121   : > { %v688_v39 = vadd.f32 %v685_v37, %v212_v35 }
 0x123   : > { %690 = vst.msk [vmem:[#allocation2] sm:$0xf] %vm208_vm1, %v688_v39 }
 0x12a   : > { %v700_v48 = vld [vmem:[#allocation2] sm:$0xf] }
 0x156   : > { %v723_v44 = vpop.trf.xlu0 }
 0x157   : > { %v742_v45 = vrot.slane %v723_v44, %v741_v42 }
 0x159   : > { %v743_v46 = vmul.f32 %v742_v45, %v706_v20 }
 0x15b   : > { %v744_v47 = vmul.f32 256.0, %v743_v46 }
 0x15d   : > { %v745_v50 = vsub.f32 %v700_v48, %v744_v47 }
 0x15f   : > { %v753_v51 = vmul.f32 %v894_v49, %v745_v50 }
 0x161   : > { %v754_v52 = vsel %vm208_vm1, %v753_v51, 0.0 }
 0x162   : > { %755 = vadd.xlane.f32.xlu1 %v754_v52 }
 0x1ef   : > { %v756_v53 = vpop.xlane.xlu1 %755 }
 0x1f0   : > { %v757_v54 = vmul.f32 0.00390625, %v756_v53 }
 0x1f2   : > { %v758_v55 = vmax.f32 %v757_v54, 0.0 }
 0x1f4   : > { %v759_v56 = vadd.f32 1e-05, %v758_v55 }
 0x1f6   : > { %955 = vrsqrt.f32 %v759_v56 }
 0x200   : > { %v956_v57 = vpop.eup %955 }
 0x201   : > { %761 = vxpose.xlu1.b32.start.end [1/1] (short) (narrow) %v956_v57, 8 }
 0x281   : > { %v777_v58 = vpop.trf.xlu1 }
 0x282   : > { %v796_v59 = vrot.slane %v777_v58, %v741_v42 }
 0x284   : > { %v797_v60 = vmul.f32 %v956_v57, %v796_v59 }
 0x286   : > { %v798_v62 = vmul.f32 %v797_v60, %v745_v50 }
 0x288   : > { %v800_v63 = vmul.f32 %v799_v61, %v798_v62 }
 0x28a   : > { %v801_v0 = vsel %vm208_vm1, %v800_v63, 0.0 }
 0x28b   : > { %802 = vadd.xlane.f32.xlu0 %v801_v0 }
 0x318   : > { %v803_v2 = vpop.xlane.xlu0 %802 }
 0x319   : > { %v805_v3 = vadd.f32 %v804_v1, %v803_v2 }
 0x31b   : > { %807 = vst.msk [vmem:[%s203_s9] sm:$0xf] %vm806_vm3, %v805_v3 }
 0x31c PF: > { %s16_s17 = sadd.s32 1, %s1037_s17   ;;  %s1208_s12 = smov %s1021_s13 }
 0x31d   : > { %p13_p9 = scmp.ge.s32.totalorder %s16_s17, 4   ;;  %s1209_s13 = smov %s1025_s14 }
 0x31e   : > { %s1210_s14 = smov %s1110_s24  ;;  %s1211_s15 = smov %s1033_s16 }
 0x31f   : > { %s1212_s16 = smov %s1214_s19  ;;  %15 = sbr.rel (!%p13_p9) target bundleno = 4 (0x4), region = 80 }
 0x326   :  { %827 = vsyncpa [#allocation5], 1 }
 0x327   :  { %829 = vsyncpa [#allocation5 + $0x1], 1 }

</bundles_post_ra>
